<compile_context>
chip_gen: v6e
topology: v6e:2x2x1
jax: 0.10.0
libtpu: 0.0.40
codegen_flags: <defaults>
</compile_context>

<pallas_src>
import jax
import jax.numpy as jnp
from jax.experimental import pallas as pl
from jax.experimental.pallas import tpu as pltpu


def decoder_kernel(z_ref, w1_ref, b1_ref, w2_ref, b2_ref, o_ref):
    # First linear: bf16 operands on the MXU, f32 accumulate.
    z = z_ref[...].astype(jnp.bfloat16)
    h = jnp.dot(z, w1_ref[...], preferred_element_type=jnp.float32)
    # Bias + ReLU in f32 on the VPU.
    h = jnp.maximum(h + b1_ref[...], 0.0)
    # Second linear: cast the f32 activations to bf16 only at the dot input.
    logits = jnp.dot(h.astype(jnp.bfloat16), w2_ref[...],
                     preferred_element_type=jnp.float32)
    x = logits + b2_ref[...]
    # sigmoid(x) = 1 / (1 + exp(-x)); exp and approx-reciprocal both go to the
    # EUP slot, leaving the VALU free for the bias/ReLU epilogue.
    o_ref[...] = pl.reciprocal(1.0 + jnp.exp(-x), approx=True).astype(o_ref.dtype)


def _round_up(n, m):
    return ((n + m - 1) // m) * m


def _pad2d(x, rows, cols):
    r, c = x.shape
    if r == rows and c == cols:
        return x
    return jnp.pad(x, ((0, rows - r), (0, cols - c)))


def prepare_decoder_params(w1_t, b1, w2_t, b2):
    """One-time parameter prep (pad feature dims to 128 lanes, cast weights to bf16).

    w1_t: (L, H); b1: (1, H); w2_t: (H, D); b2: (1, D).
    Padding is semantics-preserving: padded H columns are relu(0 + 0) = 0 and
    hit zero rows of W2; padded D columns are sliced off by the caller.
    """
    L, H = w1_t.shape
    D = w2_t.shape[1]
    Hp = _round_up(H, 128)
    Dp = _round_up(D, 128)
    w1_p = _pad2d(w1_t, L, Hp).astype(jnp.bfloat16)
    w2_p = _pad2d(w2_t, Hp, Dp).astype(jnp.bfloat16)
    b1_p = _pad2d(b1, 1, Hp).astype(jnp.float32)
    b2_p = _pad2d(b2, 1, Dp).astype(jnp.float32)
    return w1_p, b1_p, w2_p, b2_p


def decoder_forward(z, w1_p, b1_p, w2_p, b2_p, *, block_batch=2048):
    """z: (B, L) f32; prepped params from `prepare_decoder_params`.

    Returns the lane-dense padded output (B, Dp) in bf16; callers that need
    exactly (B, D) slice the trailing feature columns themselves (kept out of
    the hot path so downstream consumers can use the padded form directly).
    """
    B, L = z.shape
    assert w1_p.shape[0] == L
    Hp = w1_p.shape[1]
    Dp = w2_p.shape[1]

    # Batch tile: multiple of 8 sublanes; capped so the grid has >=2 steps
    # whenever B allows it (both v7x TensorCores via "parallel" semantics).
    TM = min(block_batch, max(8, _round_up(pl.cdiv(B, 2), 8)))
    grid = (pl.cdiv(B, TM),)

    cost = pl.CostEstimate(
        flops=2 * B * (L * Hp + Hp * Dp),
        transcendentals=B * Dp,
        bytes_accessed=(z.size * 4                      # z read (f32, unpadded)
                        + w1_p.size * 2 + w2_p.size * 2  # bf16 weights
                        + b1_p.size * 4 + b2_p.size * 4  # f32 biases
                        + B * Dp * 2),                   # bf16 output
    )

    # VMEM budget: double-buffered z / out tiles, resident (double-buffered)
    # weights + biases, f32 intermediates (TM x Hp activation, TM x Dp logits),
    # plus slack; clamped to stay inside v7x's 64 MiB VMEM.
    vmem_bytes = (2 * (TM * L * 4 + TM * Dp * 2)                       # z, out tiles
                  + 2 * (L * Hp * 2 + Hp * Dp * 2 + Hp * 4 + Dp * 4)   # weights/biases
                  + TM * (Hp + Dp) * 4                                 # f32 intermediates
                  + (1 << 20))
    vmem_bytes = int(min(max(vmem_bytes, 4 << 20), 32 << 20))

    return pl.pallas_call(
        decoder_kernel,
        out_shape=jax.ShapeDtypeStruct((B, Dp), jnp.bfloat16),
        grid_spec=pl.GridSpec(
            grid=grid,
            in_specs=[
                pl.BlockSpec((TM, L), lambda i: (i, 0)),   # z tile, full (unpadded) minor dim
                pl.BlockSpec((L, Hp), lambda i: (0, 0)),   # W1 resident
                pl.BlockSpec((1, Hp), lambda i: (0, 0)),   # b1 resident
                pl.BlockSpec((Hp, Dp), lambda i: (0, 0)),  # W2 resident
                pl.BlockSpec((1, Dp), lambda i: (0, 0)),   # b2 resident
            ],
            out_specs=pl.BlockSpec((TM, Dp), lambda i: (i, 0)),
        ),
        compiler_params=pltpu.CompilerParams(
            dimension_semantics=("parallel",),   # shard batch steps across TCs (v7x)
            vmem_limit_bytes=vmem_bytes,
        ),
        cost_estimate=cost,
    )(z, w1_p, b1_p, w2_p, b2_p)


def init_linear_params(key, in_features, out_features):
    # Deterministic init mimicking PyTorch nn.Linear default (uniform +/- 1/sqrt(fan_in)).
    kw, kb = jax.random.split(key)
    bound = 1.0 / jnp.sqrt(jnp.float32(in_features))
    # Stored already transposed: (in_features, out_features)
    w_t = jax.random.uniform(kw, (in_features, out_features), jnp.float32,
                             minval=-bound, maxval=bound)
    b = jax.random.uniform(kb, (1, out_features), jnp.float32,
                           minval=-bound, maxval=bound)
    return w_t, b


if __name__ == "__main__":
    # Small shapes consistent with the module: Decoder(input_size=64,
    # hidden_size=32, latent_size=16), batch=8.
    batch, latent_size, hidden_size, input_size = 8, 16, 32, 64

    key = jax.random.PRNGKey(0)
    kz, k1, k2 = jax.random.split(key, 3)

    z = jax.random.normal(kz, (batch, latent_size), jnp.float32)
    w1_t, b1 = init_linear_params(k1, latent_size, hidden_size)
    w2_t, b2 = init_linear_params(k2, hidden_size, input_size)

    # One-time parameter prep (hoisted out of the forward path).
    w1_p, b1_p, w2_p, b2_p = prepare_decoder_params(w1_t, b1, w2_t, b2)

    out_padded = decoder_forward(z, w1_p, b1_p, w2_p, b2_p)
    out_padded = jax.block_until_ready(out_padded)

    # Slice off the lane padding only for the reference comparison.
    out = out_padded[:, :input_size].astype(jnp.float32)

    # Pure-JAX f32 reference of the forward semantics (kernel uses bf16 MXU
    # operands, bf16 output and approx reciprocal, so allow a small tolerance).
    h1_ref = jax.nn.relu(z @ w1_t + b1)
    out_ref = jax.nn.sigmoid(h1_ref @ w2_t + b2)
    assert out.shape == (batch, input_size)
    err = float(jnp.max(jnp.abs(out - out_ref)))
    assert err < 2e-2, err

    print("KERNEL_OK")
</pallas_src>

<mosaic_0001>
module attributes {stable_mosaic.version = 11 : i64} {
  func.func @decoder_kernel(%arg0: i32, %arg1: memref<8x16xf32, #tpu.memory_space<vmem>>, %arg2: memref<16x128xbf16, #tpu.memory_space<vmem>>, %arg3: memref<1x128xf32, #tpu.memory_space<vmem>>, %arg4: memref<128x128xbf16, #tpu.memory_space<vmem>>, %arg5: memref<1x128xf32, #tpu.memory_space<vmem>>, %arg6: memref<8x128xbf16, #tpu.memory_space<vmem>>) attributes {dimension_semantics = [#tpu.dimension_semantics<parallel>], iteration_bounds = array<i64: 1>, scalar_prefetch = 0 : i64, scratch_operands = 0 : i64, tpu.core_type = #tpu.core_type<tc>, window_params = [{transform_indices = @transform_0, window_bounds = array<i64: 8, 16>}, {pipeline_mode = #tpu.pipeline_mode<synchronous>, transform_indices = @transform_1, window_bounds = array<i64: 16, 128>}, {pipeline_mode = #tpu.pipeline_mode<synchronous>, transform_indices = @transform_2, window_bounds = array<i64: 1, 128>}, {pipeline_mode = #tpu.pipeline_mode<synchronous>, transform_indices = @transform_3, window_bounds = array<i64: 128, 128>}, {pipeline_mode = #tpu.pipeline_mode<synchronous>, transform_indices = @transform_4, window_bounds = array<i64: 1, 128>}, {transform_indices = @transform_5, window_bounds = array<i64: 8, 128>}]} {
    %c0 = arith.constant 0 : index
    %c0_0 = arith.constant 0 : index
    %0 = vector.load %arg1[%c0, %c0_0] : memref<8x16xf32, #tpu.memory_space<vmem>>, vector<8x16xf32>
    %1 = arith.truncf %0 : vector<8x16xf32> to vector<8x16xbf16>
    %c0_1 = arith.constant 0 : index
    %c0_2 = arith.constant 0 : index
    %2 = vector.load %arg2[%c0_1, %c0_2] : memref<16x128xbf16, #tpu.memory_space<vmem>>, vector<16x128xbf16>
    %cst = arith.constant dense<0.000000e+00> : vector<8x128xf32>
    %3 = tpu.matmul %1, %2, %cst {dimension_numbers = #tpu.dot_dimension_numbers<[1], [0], [0], [1], [0, 0, 1, 1], [], []>} : vector<8x16xbf16>, vector<16x128xbf16>, vector<8x128xf32> -> vector<8x128xf32>
    %c0_3 = arith.constant 0 : index
    %c0_4 = arith.constant 0 : index
    %4 = vector.load %arg3[%c0_3, %c0_4] : memref<1x128xf32, #tpu.memory_space<vmem>>, vector<1x128xf32>
    %5 = vector.broadcast %4 : vector<1x128xf32> to vector<8x128xf32>
    %6 = arith.addf %3, %5 : vector<8x128xf32>
    %cst_5 = arith.constant 0.000000e+00 : f32
    %7 = vector.broadcast %cst_5 : f32 to vector<8x128xf32>
    %8 = arith.maximumf %6, %7 : vector<8x128xf32>
    %9 = arith.truncf %8 : vector<8x128xf32> to vector<8x128xbf16>
    %c0_6 = arith.constant 0 : index
    %c0_7 = arith.constant 0 : index
    %10 = vector.load %arg4[%c0_6, %c0_7] : memref<128x128xbf16, #tpu.memory_space<vmem>>, vector<128x128xbf16>
    %cst_8 = arith.constant dense<0.000000e+00> : vector<8x128xf32>
    %11 = tpu.matmul %9, %10, %cst_8 {dimension_numbers = #tpu.dot_dimension_numbers<[1], [0], [0], [1], [0, 0, 1, 1], [], []>} : vector<8x128xbf16>, vector<128x128xbf16>, vector<8x128xf32> -> vector<8x128xf32>
    %c0_9 = arith.constant 0 : index
    %c0_10 = arith.constant 0 : index
    %12 = vector.load %arg5[%c0_9, %c0_10] : memref<1x128xf32, #tpu.memory_space<vmem>>, vector<1x128xf32>
    %13 = vector.broadcast %12 : vector<1x128xf32> to vector<8x128xf32>
    %14 = arith.addf %11, %13 : vector<8x128xf32>
    %cst_11 = arith.constant 0.000000e+00 : f32
    %15 = vector.broadcast %cst_11 : f32 to vector<8x128xf32>
    %16 = arith.subf %15, %14 : vector<8x128xf32>
    %17 = math.exp %16 : vector<8x128xf32>
    %cst_12 = arith.constant 1.000000e+00 : f32
    %18 = vector.broadcast %cst_12 : f32 to vector<8x128xf32>
    %19 = arith.addf %18, %17 : vector<8x128xf32>
    %20 = tpu.reciprocal %19 {approx = true} : vector<8x128xf32> -> vector<8x128xf32>
    %21 = arith.truncf %20 : vector<8x128xf32> to vector<8x128xbf16>
    %c0_13 = arith.constant 0 : index
    %c0_14 = arith.constant 0 : index
    %22 = vector.load %arg6[%c0_13, %c0_14] : memref<8x128xbf16, #tpu.memory_space<vmem>>, vector<8x128xbf16>
    tpu.vector_store %arg6[%c0_13, %c0_14], %21 {strides = array<i32>} : memref<8x128xbf16, #tpu.memory_space<vmem>>, vector<8x128xbf16>,
    return
  }
  func.func @transform_0(%arg0: i32) -> (i32, i32) {
    %c0_i32 = arith.constant 0 : i32
    %c0_i32_0 = arith.constant 0 : i32
    return %arg0, %c0_i32 : i32, i32
  }
  func.func @transform_1(%arg0: i32) -> (i32, i32) {
    %c0_i32 = arith.constant 0 : i32
    %c0_i32_0 = arith.constant 0 : i32
    %c0_i32_1 = arith.constant 0 : i32
    return %c0_i32, %c0_i32_0 : i32, i32
  }
  func.func @transform_2(%arg0: i32) -> (i32, i32) {
    %c0_i32 = arith.constant 0 : i32
    %c0_i32_0 = arith.constant 0 : i32
    %c0_i32_1 = arith.constant 0 : i32
    return %c0_i32, %c0_i32_0 : i32, i32
  }
  func.func @transform_3(%arg0: i32) -> (i32, i32) {
    %c0_i32 = arith.constant 0 : i32
    %c0_i32_0 = arith.constant 0 : i32
    %c0_i32_1 = arith.constant 0 : i32
    return %c0_i32, %c0_i32_0 : i32, i32
  }
  func.func @transform_4(%arg0: i32) -> (i32, i32) {
    %c0_i32 = arith.constant 0 : i32
    %c0_i32_0 = arith.constant 0 : i32
    %c0_i32_1 = arith.constant 0 : i32
    return %c0_i32, %c0_i32_0 : i32, i32
  }
  func.func @transform_5(%arg0: i32) -> (i32, i32) {
    %c0_i32 = arith.constant 0 : i32
    %c0_i32_0 = arith.constant 0 : i32
    return %arg0, %c0_i32 : i32, i32
  }
}

</mosaic_0001>

<bundles_post_ra>
// kernel: tpu_custom_call.1
= control target key start
LH: loop header
LB: loop body
LE: loop exit
PB: predicated region body
PF: predicated region fallthrough
CT: control target
= control target key end

     0   :  { %10 = vsyncpa [#allocation3], 0  ;;  %s470_s0 = inlined_call_operand.hbm [shape: f32[8,16], index: 0, kind: input, shape index: {}]   ;;  %s471_s1 = inlined_call_operand.hbm [shape: bf16[16,128], index: 1, kind: input, shape index: {}]   ;;  %s472_s2 = inlined_call_operand.vmem [shape: f32[1,128], index: 2, kind: input, shape index: {}]   ;;  %s473_s3 = inlined_call_operand.hbm [shape: bf16[128,128], index: 3, kind: input, shape index: {}]   ;;  %s474_s4 = inlined_call_operand.vmem [shape: f32[1,128], index: 4, kind: input, shape index: {}]   ;;  %s475_s5 = inlined_call_operand.hbm [shape: bf16[8,128], index: 5, kind: output, shape index: {}]  }
   0x1   :  { %11 = vsyncpa [#allocation6], 0 }
   0x2   :  { %12 = vsyncpa [#allocation4], 0  ;;  %s414_s18 = smov [#allocation5]  }
   0x3   :  { %s28_s19 = sshll.u32 %s414_s18, 4  ;;  %s29_s19 = int_to_ptr.vmem [resolvable:$true] %s28_s19 }
   0x4   :  { %s336_s20 = scalar_lea.vmem %s29_s19, 128  ;;  %p341_p1 = scmp.lt.s32.totalorder %s29_s19, %s29_s19 }
   0x5   :  { %p337_p0 = scmp.ne.s32.totalorder %s29_s19, %s336_s20  ;;  %p342_p2 = scmp.lt.s32.totalorder %s336_s20, %s336_s20 }
   0x7   :  { %p343_p3 = por %p342_p2, %p341_p1 }
   0x9   :  { %p344_p4 = pnand %p343_p3, %p337_p0 }
   0xb   :  { %347 = shalt.err (!%p344_p4)
}
   0xc   :  { %s415_s21 = smov 64   ;;  %s416_s22 = smov 4  }
   0xd   :  { %34 = dma.hbm_to_vmem [thread:$0]  %s471_s1, 128, %s29_s19, [#allocation6], %s415_s21, %s415_s21, %s416_s22  }
   0xe   :  { %s417_s25 = smov [#allocation2]   ;;  %s418_s27 = smov [#allocation7]  }
   0xf   :  { %s19_s26 = sshll.u32 %s417_s25, 4  ;;  %s42_s28 = sshll.u32 %s418_s27, 4  ;;  %s20_s26 = int_to_ptr.vmem [resolvable:$true] %s19_s26  ;;  %s43_s28 = int_to_ptr.vmem [resolvable:$true] %s42_s28 }
  0x10   :  { %s356_s29 = scalar_lea.vmem %s20_s26, 128  ;;  %p361_p6 = scmp.lt.s32.totalorder %s20_s26, %s20_s26 }
  0x11   :  { %p357_p5 = scmp.ne.s32.totalorder %s20_s26, %s356_s29  ;;  %p362_p7 = scmp.lt.s32.totalorder %s356_s29, %s356_s29 }
  0x13   :  { %p363_p8 = por %p362_p7, %p361_p6 }
  0x15   :  { %p364_p9 = pnand %p363_p8, %p357_p5 }
  0x17   :  { %367 = shalt.err (!%p364_p9)
}
  0x18   :  { %22 = dma.hbm_to_vmem [thread:$0]  %s470_s0, 128, %s20_s26, [#allocation3]  }
  0x19   :  { %s376_s7 = scalar_lea.vmem %s43_s28, 1024  ;;  %p381_p11 = scmp.lt.s32.totalorder %s43_s28, %s43_s28 }
  0x1a   :  { %p377_p10 = scmp.ne.s32.totalorder %s43_s28, %s376_s7  ;;  %p382_p12 = scmp.lt.s32.totalorder %s376_s7, %s376_s7 }
  0x1c   :  { %p383_p13 = por %p382_p12, %p381_p11 }
  0x1e   :  { %p384_p0 = pnand %p383_p13, %p377_p10 }
  0x20   :  { %387 = shalt.err (!%p384_p0)
}
  0x21   :  { %48 = dma.hbm_to_vmem [thread:$0]  %s473_s3, 1024, %s43_s28, [#allocation6], %s415_s21, %s415_s21, %s416_s22  }
  0x22   :  { %408 = dma.done.wait [#allocation3], 128  }
  0x23   :  { %409 = vsyncadd [#allocation3], 4294967168 }
  0x24   :  { %410 = dma.done.wait [#allocation6], 1152  }
  0x25   :  { %411 = vsyncadd [#allocation6], 4294966144  ;;  %v419_v0 = vmov 0.0   ;;  %vm420_vm0 = vmmov 0   ;;  %v315_v1 = vld [vmem:[#allocation5] sm:$0xff]   ;;  %v61_v2 = vld [vmem:[#allocation2] sm:$0xff] }
  0x26   :  { %281 = vmatprep.subr.bf16.mxu0 %v419_v0  ;;  %283 = vmatprep.mubr.msk.bf16.mxu0 %vm420_vm0, %v419_v0  ;;  %v62_v3 = vpack.c.bf16 %v61_v2, %v61_v2  ;;  %vm78_vm1 = vcmask 130048   ;;  %v316_v4 = vld [vmem:[#allocation7 + $0x38] sm:$0xff]   ;;  %v317_v5 = vld [vmem:[#allocation7 + $0x30] sm:$0xff]   ;;  %v318_v6 = vld [vmem:[#allocation7 + $0x28] sm:$0xff]  }
  0x27   :  { %287 = vmatprep.subr.bf16.mxu1 %v419_v0  ;;  %303 = vmatprep.mubr.msk.bf16.mxu1 %vm420_vm0, %v419_v0  ;;  %v319_v7 = vld [vmem:[#allocation7 + $0x20] sm:$0xff]   ;;  %v320_v8 = vld [vmem:[#allocation7 + $0x18] sm:$0xff]   ;;  %v321_v9 = vld [vmem:[#allocation7 + $0x10] sm:$0xff]  }
  0x28   :  { %282 = vmatpush3.bf16.msra.mxu0 %v315_v1  ;;  %288 = vmatpush3.bf16.msra.mxu1 %v316_v4  ;;  %v322_v10 = vld [vmem:[#allocation7 + $0x8] sm:$0xff]   ;;  %v323_v11 = vld [vmem:[#allocation7] sm:$0xff]   ;;  %v258_v12 = vld [vmem:[%s472_s2] ss:$0 sm:$0xff]  ;;  %s421_s2 = smov [#allocation8]  }
  0x29   :  { %289 = vmatprep.subr.bf16.mxu1 %v419_v0  ;;  %v261_v20 = vld [vmem:[%s474_s4] ss:$0 sm:$0xff]  ;;  %s248_s11 = sshll.u32 %s421_s2, 4  ;;  %s249_s11 = int_to_ptr.vmem [resolvable:$true] %s248_s11 }
  0x2a   :  { %s388_s12 = scalar_lea.vmem %s249_s11, 64  ;;  %p393_p2 = scmp.lt.s32.totalorder %s249_s11, %s249_s11 }
  0x2b   :  { %284 = vmatmul.mubr.msk.bf16.vlgmr.msra.gmra.mxu0 %vm78_vm1, %v62_v3  ;;  %p389_p1 = scmp.ne.s32.totalorder %s249_s11, %s388_s12  ;;  %p394_p3 = scmp.lt.s32.totalorder %s388_s12, %s388_s12 }
  0x2c   :  { %290 = vmatpush3.bf16.msra.mxu1 %v317_v5 }
  0x2d   :  { %291 = vmatprep.subr.bf16.mxu1 %v419_v0  ;;  %p395_p4 = por %p394_p3, %p393_p2 }
  0x2f   :  { %p396_p5 = pnand %p395_p4, %p389_p1 }
  0x30   :  { %292 = vmatpush3.bf16.msra.mxu1 %v318_v6 }
  0x31   :  { %293 = vmatprep.subr.bf16.mxu1 %v419_v0 }
  0x34   :  { %294 = vmatpush3.bf16.msra.mxu1 %v319_v7 }
  0x35   :  { %295 = vmatprep.subr.bf16.mxu1 %v419_v0 }
  0x38   :  { %296 = vmatpush3.bf16.msra.mxu1 %v320_v8 }
  0x39   :  { %297 = vmatprep.subr.bf16.mxu1 %v419_v0 }
  0x3c   :  { %298 = vmatpush3.bf16.msra.mxu1 %v321_v9 }
  0x3d   :  { %299 = vmatprep.subr.bf16.mxu1 %v419_v0 }
  0x40   :  { %300 = vmatpush3.bf16.msra.mxu1 %v322_v10 }
  0x41   :  { %301 = vmatprep.subr.bf16.mxu1 %v419_v0 }
  0x44   :  { %302 = vmatpush3.bf16.msra.mxu1 %v323_v11 }
  0xeb   :  { %v116_v13 = vpop.f32.mrf.mxu0 }
  0xec   :  { %v117_v14 = vadd.f32 %v258_v12, %v116_v13 }
  0xed   :  { %v285_v15 = vpop.f32.mrf.mxu0 }
  0xee   :  { %v122_v16 = vmax.f32 %v117_v14, 0.0 }
  0xef   :  { %v119_v17 = vpop.f32.mrf.mxu0 }
  0xf0   :  { %v123_v18 = vpack.c.bf16 %v122_v16, %v122_v16 }
  0xf1   :  { %v286_v19 = vpop.f32.mrf.mxu0 }
  0xf2   :  { %304 = vmatmul.mubr.bf16.vlgmr.msra.gmra.mxu1 %v123_v18 }
 0x1b2   :  { %v229_v21 = vpop.f32.mrf.mxu1 }
 0x1b3   :  { %v230_v22 = vadd.f32 %v261_v20, %v229_v21 }
 0x1b4   :  { %v305_v23 = vpop.f32.mrf.mxu1 }
 0x1b5   :  { %v235_v24 = vsub.f32 0.0, %v230_v22 }
 0x1b6   :  { %v232_v25 = vpop.f32.mrf.mxu1 }
 0x1b7   :  { %v236_v26 = vmul.f32 1.442695, %v235_v24 }
 0x1b8   :  { %v306_v27 = vpop.f32.mrf.mxu1 }
 0x1b9   :  { %324 = vpow2.f32 %v236_v26 }
 0x1c6   :  { %v325_v28 = vpop.eup %324 }
 0x1c7   :  { %v238_v29 = vadd.f32 1.0, %v325_v28 }
 0x1c9   :  { %326 = vrcp.f32 %v238_v29 }
 0x1d6   :  { %v327_v30 = vpop.eup %326 }
 0x1d7   :  { %v240_v31 = vpack.c.bf16 %v327_v30, %v327_v30 }
 0x1d9   :  { %241 = vst [vmem:[#allocation8] sm:$0xf] %v240_v31 }
 0x1da   :  { %399 = shalt.err (!%p396_p5)
}
 0x1db   :  { %251 = dma.vmem_to_hbm [thread:$0]  %s249_s11, 64, %s475_s5, [#allocation4]  }
 0x1dc   :  { %412 = dma.done.wait [#allocation4], 64  }
 0x1dd   :  { %413 = vsyncadd [#allocation4], 4294967232 }
 0x1de   :  { %255 = vsyncpa [#allocation3], 1 }
 0x1df   :  { %256 = vsyncpa [#allocation6], 1 }
 0x1e0   :  { %257 = vsyncpa [#allocation4], 1 }

</bundles_post_ra>
